<compile_context>
chip_gen: v6e
topology: v6e:2x2x1
jax: 0.10.0
libtpu: 0.0.40
codegen_flags: <defaults>
</compile_context>

<pallas_src>
import numpy as np
import jax
import jax.numpy as jnp
from jax.experimental import pallas as pl
from jax.experimental.pallas import tpu as pltpu


def _pe_kernel(scal_ref, const_ref, out_ref):
    # scal_ref : SMEM f32[3]    = [last_time_stamp, current_time_stamp, max_time_stamp]
    # const_ref: VMEM f32[5, W] = [freq, phase, emb_mask, ttl_mask, tog_mask]
    # out_ref  : VMEM f32[TB, W]
    last = scal_ref[0]
    cur = scal_ref[1]
    mx = scal_ref[2]

    t = cur / mx
    ttl = 1.0 - t                      # total_time_left
    tog = (cur - last) / mx            # time_of_generation

    c = const_ref[...]                 # (5, W)
    freq, phase = c[0:1, :], c[1:2, :]
    m_emb, m_ttl, m_tog = c[2:3, :], c[3:4, :], c[4:5, :]

    # Single EUP pass over one row: cos(x) == sin(x + pi/2) via the phase constant.
    row = m_emb * jnp.sin(t * freq + phase) + m_ttl * ttl + m_tog * tog   # (1, W)

    # Every batch row is identical: sublane-broadcast the row into the tile.
    out_ref[...] = jnp.broadcast_to(row, out_ref.shape)


def _row_constants(d_model):
    """Trace-time (5, d_model) column constants: freq, phase, emb/ttl/tog masks."""
    D = d_model
    i = np.arange(D)
    exp_even = (i // 2) * 2                                  # i (even) / i-1 (odd)
    freq = np.where(i < D - 2, (D - 2) * np.exp2(-exp_even.astype(np.float64)), 0.0)
    phase = np.where((i % 2 == 1) & (i < D - 2), np.pi / 2.0, 0.0)
    m_emb = (i < D - 2).astype(np.float64)
    m_ttl = (i == D - 2).astype(np.float64)
    m_tog = (i == D - 1).astype(np.float64)
    return np.stack([freq, phase, m_emb, m_ttl, m_tog]).astype(np.float32)


def positional_encoding(last_time_stamp, current_time_stamp, max_time_stamp,
                        batch_size, d_model, *, tile_bytes=4 << 20):
    scalars = jnp.array(
        [last_time_stamp, current_time_stamp, max_time_stamp], dtype=jnp.float32
    )
    row_const = _row_constants(d_model)                      # (5, d_model)

    # Lane-dense output path: view the row-major (B, D) output as (B*D/128, 128).
    lane_dense_flat = (
        d_model < 128
        and 128 % d_model == 0
        and (batch_size * d_model) % 128 == 0
    )
    if lane_dense_flat:
        n_rep = 128 // d_model
        const_np = np.tile(row_const, (1, n_rep))            # (5, 128)
        out_rows = (batch_size * d_model) // 128
        out_cols = 128
    else:
        const_np = row_const
        out_rows = batch_size
        out_cols = d_model
    const = jnp.asarray(const_np)

    # Batch-tile sizing: whole extent if small, else a multiple-of-8 row tile
    # capped at ~tile_bytes so it double-buffers within scoped VMEM on all gens.
    row_bytes = out_cols * 4
    if out_rows * row_bytes <= tile_bytes:
        tb = out_rows
    else:
        tb = max(8, min(1024, (tile_bytes // row_bytes) // 8 * 8))
    grid = (pl.cdiv(out_rows, tb),)

    out = pl.pallas_call(
        _pe_kernel,
        out_shape=jax.ShapeDtypeStruct((out_rows, out_cols), jnp.float32),
        grid=grid,
        in_specs=[
            pl.BlockSpec(memory_space=pltpu.MemorySpace.SMEM),      # scalars
            pl.BlockSpec((5, out_cols), lambda i: (0, 0)),          # constants (resident)
        ],
        out_specs=pl.BlockSpec((tb, out_cols), lambda i: (i, 0)),
        compiler_params=pltpu.CompilerParams(
            dimension_semantics=("parallel",),
        ),
    )(scalars, const)

    if lane_dense_flat:
        out = out.reshape(batch_size, d_model)                # row-major bitcast reshape
    return out


def _reference(last, cur, mx, batch_size, d_model):
    # Pure-numpy re-implementation of the PyTorch forward for verification.
    t = cur / mx
    emb = np.zeros((batch_size, d_model - 2), dtype=np.float32)
    for i in range(d_model - 2):
        if i % 2 == 0:
            emb[:, i] = np.sin(np.float32(t / (2 ** i / (d_model - 2))))
        else:
            emb[:, i] = np.cos(np.float32(t / (2 ** (i - 1) / (d_model - 2))))
    ttl = np.full((batch_size, 1), 1.0 - t, dtype=np.float32)
    tog = np.full((batch_size, 1), (cur - last) / mx, dtype=np.float32)
    return np.concatenate([emb, ttl, tog], axis=1)


if __name__ == "__main__":
    key = jax.random.PRNGKey(0)
    d_model = 32

    # Deterministic example timestamps derived from the PRNG key.
    vals = jax.random.uniform(key, (2,), minval=0.0, maxval=10.0)
    last_time_stamp = float(jnp.minimum(vals[0], vals[1]))
    current_time_stamp = float(jnp.maximum(vals[0], vals[1]))
    max_time_stamp = 16.0

    # batch_size=2 exercises the general (TB, D) path;
    # batch_size=8 exercises the lane-dense flattened (B*D/128, 128) path.
    for batch_size in (2, 8):
        out = positional_encoding(
            last_time_stamp, current_time_stamp, max_time_stamp, batch_size, d_model
        )
        out = jax.block_until_ready(out)

        ref = _reference(
            last_time_stamp, current_time_stamp, max_time_stamp, batch_size, d_model
        )
        np.testing.assert_allclose(np.asarray(out), ref, rtol=1e-4, atol=5e-5)
        assert out.shape == (batch_size, d_model)

    print("KERNEL_OK")
</pallas_src>

<mosaic_0001>
module attributes {stable_mosaic.version = 11 : i64} {
  func.func @_pe_kernel(%arg0: i32, %arg1: memref<3xf32, #tpu.memory_space<smem>>, %arg2: memref<5x32xf32, #tpu.memory_space<vmem>>, %arg3: memref<2x32xf32, #tpu.memory_space<vmem>>) attributes {dimension_semantics = [#tpu.dimension_semantics<parallel>], iteration_bounds = array<i64: 1>, scalar_prefetch = 0 : i64, scratch_operands = 0 : i64, tpu.core_type = #tpu.core_type<tc>, window_params = [{transform_indices = @transform_0, window_bounds = array<i64: 3>}, {pipeline_mode = #tpu.pipeline_mode<synchronous>, transform_indices = @transform_1, window_bounds = array<i64: 5, 32>}, {transform_indices = @transform_2, window_bounds = array<i64: 2, 32>}]} {
    %c0 = arith.constant 0 : index
    %0 = memref.load %arg1[%c0] : memref<3xf32, #tpu.memory_space<smem>>
    %c1 = arith.constant 1 : index
    %1 = memref.load %arg1[%c1] : memref<3xf32, #tpu.memory_space<smem>>
    %c2 = arith.constant 2 : index
    %2 = memref.load %arg1[%c2] : memref<3xf32, #tpu.memory_space<smem>>
    %3 = arith.divf %1, %2 : f32
    %cst = arith.constant 1.000000e+00 : f32
    %4 = arith.subf %cst, %3 : f32
    %5 = arith.subf %1, %0 : f32
    %6 = arith.divf %5, %2 : f32
    %c0_0 = arith.constant 0 : index
    %c0_1 = arith.constant 0 : index
    %7 = vector.load %arg2[%c0_0, %c0_1] : memref<5x32xf32, #tpu.memory_space<vmem>>, vector<5x32xf32>
    %8 = vector.extract_strided_slice %7 {offsets = [0, 0], sizes = [1, 32], strides = [1, 1]} : vector<5x32xf32> to vector<1x32xf32>
    %9 = vector.extract_strided_slice %7 {offsets = [1, 0], sizes = [1, 32], strides = [1, 1]} : vector<5x32xf32> to vector<1x32xf32>
    %10 = vector.extract_strided_slice %7 {offsets = [2, 0], sizes = [1, 32], strides = [1, 1]} : vector<5x32xf32> to vector<1x32xf32>
    %11 = vector.extract_strided_slice %7 {offsets = [3, 0], sizes = [1, 32], strides = [1, 1]} : vector<5x32xf32> to vector<1x32xf32>
    %12 = vector.extract_strided_slice %7 {offsets = [4, 0], sizes = [1, 32], strides = [1, 1]} : vector<5x32xf32> to vector<1x32xf32>
    %13 = vector.broadcast %3 : f32 to vector<1x32xf32>
    %14 = arith.mulf %13, %8 : vector<1x32xf32>
    %15 = arith.addf %14, %9 : vector<1x32xf32>
    %16 = math.sin %15 : vector<1x32xf32>
    %17 = arith.mulf %10, %16 : vector<1x32xf32>
    %18 = vector.broadcast %4 : f32 to vector<1x32xf32>
    %19 = arith.mulf %11, %18 : vector<1x32xf32>
    %20 = arith.addf %17, %19 : vector<1x32xf32>
    %21 = vector.broadcast %6 : f32 to vector<1x32xf32>
    %22 = arith.mulf %12, %21 : vector<1x32xf32>
    %23 = arith.addf %20, %22 : vector<1x32xf32>
    %24 = vector.shape_cast %23 : vector<1x32xf32> to vector<1x32xf32>
    %25 = vector.broadcast %24 : vector<1x32xf32> to vector<2x32xf32>
    %c0_2 = arith.constant 0 : index
    %c0_3 = arith.constant 0 : index
    %26 = vector.load %arg3[%c0_2, %c0_3] : memref<2x32xf32, #tpu.memory_space<vmem>>, vector<2x32xf32>
    tpu.vector_store %arg3[%c0_2, %c0_3], %25 {strides = array<i32>} : memref<2x32xf32, #tpu.memory_space<vmem>>, vector<2x32xf32>,
    return
  }
  func.func @transform_0(%arg0: i32) -> i32 {
    %c0_i32 = arith.constant 0 : i32
    %c0_i32_0 = arith.constant 0 : i32
    return %c0_i32 : i32
  }
  func.func @transform_1(%arg0: i32) -> (i32, i32) {
    %c0_i32 = arith.constant 0 : i32
    %c0_i32_0 = arith.constant 0 : i32
    %c0_i32_1 = arith.constant 0 : i32
    return %c0_i32, %c0_i32_0 : i32, i32
  }
  func.func @transform_2(%arg0: i32) -> (i32, i32) {
    %c0_i32 = arith.constant 0 : i32
    %c0_i32_0 = arith.constant 0 : i32
    return %arg0, %c0_i32 : i32, i32
  }
}

</mosaic_0001>

<bundles_post_ra>
// kernel: tpu_custom_call.1
= control target key start
LH: loop header
LB: loop body
LE: loop exit
PB: predicated region body
PF: predicated region fallthrough
CT: control target
= control target key end

     0   :  { %7 = vsyncpa [#allocation5], 0  ;;  %s346_s0 = inlined_call_operand.hbm [shape: f32[3], index: 0, kind: input, shape index: {}]   ;;  %s347_s1 = inlined_call_operand.hbm [shape: f32[5,32], index: 1, kind: input, shape index: {}]   ;;  %s348_s2 = inlined_call_operand.hbm [shape: f32[2,32], index: 2, kind: output, shape index: {}]  }
   0x1   :  { %8 = vsyncpa [#allocation3], 0 }
   0x2   :  { %9 = vsyncpa [#allocation4], 0  ;;  %s278_s9 = smov [#allocation2]   ;;  %s279_s12 = smov [#allocation6]  }
   0x3   :  { %17 = dma.hbm_to_smem %s346_s0, 16, %s278_s9, [#allocation5]  }
   0x4   :  { %s24_s13 = sshll.u32 %s279_s12, 4  ;;  %s25_s13 = int_to_ptr.vmem [resolvable:$true] %s24_s13 }
   0x5   :  { %s240_s14 = scalar_lea.vmem %s25_s13, 128  ;;  %p245_p1 = scmp.lt.s32.totalorder %s25_s13, %s25_s13 }
   0x6   :  { %p241_p0 = scmp.ne.s32.totalorder %s25_s13, %s240_s14  ;;  %p246_p2 = scmp.lt.s32.totalorder %s240_s14, %s240_s14 }
   0x8   :  { %p247_p3 = por %p246_p2, %p245_p1 }
   0xa   :  { %p248_p4 = pnand %p247_p3, %p241_p0 }
   0xc   :  { %251 = shalt.err (!%p248_p4)
}
   0xd   :  { %27 = dma.hbm_to_vmem [thread:$0]  %s347_s1, 128, %s25_s13, [#allocation3]  }
   0xe   :  { %272 = dma.done.wait [#allocation5], 16  }
   0xf   :  { %273 = vsyncadd [#allocation5], 4294967280 }
  0x10   :  { %274 = dma.done.wait [#allocation3], 128  }
  0x11   :  { %275 = vsyncadd [#allocation3], 4294967168 }
  0x12   :  { %34 = sfence }
  0x13   :  { %s198_s0 = sld [smem:[#allocation2 + $0x2]]  ;;  %v308_v2 = vld [vmem:[#allocation6] sm:$0x1f]  ;;  %v280_v17 = vmov 683565275   ;;  %s286_s23 = smov [#allocation7]  }
  0x14   :  { %s35_s17 = sld [smem:[#allocation2]]  ;;  %v52_v3 = vrot.slane %v308_v2, 1  ;;  %v281_v19 = vmov 2475754826   ;;  %v282_v22 = vmov 2131351028  }
  0x15   :  { %s197_s18 = sld [smem:[#allocation2 + $0x1]]  ;;  %v283_v25 = vmov 2102212464   ;;  %v284_v28 = vmov 920167782   ;;  %s187_s24 = sshll.u32 %s286_s23, 4  ;;  %s188_s24 = int_to_ptr.vmem [resolvable:$true] %s187_s24 }
  0x16   :  { %v285_v31 = vmov 1326507024   ;;  %vm179_vm13 = vcmask 254976   ;;  %s252_s25 = scalar_lea.vmem %s188_s24, 32  ;;  %p257_p6 = scmp.lt.s32.totalorder %s188_s24, %s188_s24 }
  0x17   :  { %p253_p5 = scmp.ne.s32.totalorder %s188_s24, %s252_s25  ;;  %p258_p7 = scmp.lt.s32.totalorder %s252_s25, %s252_s25 }
  0x19   :  { %v38_v0 = vstv %s198_s0  ;;  %p259_p8 = por %p258_p7, %p257_p6 }
  0x1a   :  { %218 = vrcp.f32 %v38_v0 }
  0x1b   :  { %s43_s19 = ssub.f32 %s197_s18, %s35_s17  ;;  %p260_p9 = pnand %p259_p8, %p253_p5 }
  0x27   :  { %v219_v1 = vpop.eup %218 }
  0x28   :  { %203 = vpush %v219_v1 }
  0x59   :  { %s204_s20 = spop %203 }
  0x5a   :  { %s310_s21 = smul.f32 %s204_s20, %s197_s18 }
  0x5b   :  { %s312_s1 = smul.f32 %s204_s20, %s43_s19 }
  0x5c   :  { %v49_v4 = vstv %s310_s21  ;;  %s42_s22 = ssub.f32 1.0, %s310_s21 }
  0x5d   :  { %v50_v5 = vmul.f32 %v49_v4, %v308_v2 }
  0x5f   :  { %v317_v6 = vadd.f32 %v52_v3, %v50_v5 }
  0x61   :  { %v58_v7 = vand.u32 2139095040, %v317_v6  ;;  %v55_v11 = vand.u32 2147483647, %v317_v6  ;;  %vm57_vm7 = vcmp.lt.s32.totalorder %v317_v6, 0  ;;  %vm147_vm12 = vweird.f32 %v317_v6 }
  0x63   :  { %v59_v8 = vshrl.u32 %v58_v7, 23  ;;  %v62_v14 = vand.u32 8388607, %v55_v11  ;;  %vm56_vm8 = vcmp.le.f32.partialorder %v55_v11, 0.7853982  ;;  %v175_v11 = vlaneseq }
  0x65   :  { %v199_v9 = vadd.s32 4294967169, %v59_v8  ;;  %v63_v33 = vor.u32 8388608, %v62_v14 }
  0x67   :  { %v65_v10 = vadd.s32 1, %v199_v9  ;;  %v103_v47 = vshll.u32 %v63_v33, 8 }
  0x69   :  { %vm66_vm0 = vcmp.gt.s32.totalorder %v65_v10, 0 }
  0x6a   :  { %v67_v12 = vsel %vm66_vm0, %v65_v10, 0 }
  0x6b   :  { %v69_v13 = vand.u32 31, %v67_v12  ;;  %v68_v16 = vshrl.u32 %v67_v12, 5 }
  0x6d   :  { %v70_v15 = vsub.s32 32, %v69_v13  ;;  %v72_v18 = vshll.u32 %v280_v17, %v69_v13  ;;  %v75_v20 = vshll.u32 %v281_v19, %v69_v13  ;;  %v78_v24 = vshll.u32 %v282_v22, %v69_v13 }
  0x6e   :  { %v81_v27 = vshll.u32 %v283_v25, %v69_v13  ;;  %v84_v30 = vshll.u32 %v284_v28, %v69_v13  ;;  %vm87_vm1 = vcmp.lt.s32.totalorder %v68_v16, 1  ;;  %vm90_vm2 = vcmp.lt.s32.totalorder %v68_v16, 4 }
  0x6f   :  { %v73_v21 = vshrl.u32 %v281_v19, %v70_v15  ;;  %v76_v23 = vshrl.u32 %v282_v22, %v70_v15  ;;  %v79_v26 = vshrl.u32 %v283_v25, %v70_v15  ;;  %v82_v29 = vshrl.u32 %v284_v28, %v70_v15 }
  0x70   :  { %v85_v32 = vshrl.u32 %v285_v31, %v70_v15  ;;  %v71_v42 = vshrl.u32 %v280_v17, %v70_v15  ;;  %vm89_vm3 = vcmp.lt.s32.totalorder %v68_v16, 3  ;;  %vm88_vm4 = vcmp.lt.s32.totalorder %v68_v16, 2 }
  0x71   :  { %v74_v34 = vor.u32 %v73_v21, %v72_v18  ;;  %v77_v35 = vor.u32 %v76_v23, %v75_v20  ;;  %v80_v36 = vor.u32 %v79_v26, %v78_v24  ;;  %v83_v37 = vor.u32 %v82_v29, %v81_v27 }
  0x72   :  { %v86_v38 = vor.u32 %v85_v32, %v84_v30  ;;  %v163_v32 = vstv %s42_s22 }
  0x73   :  { %v92_v39 = vsel %vm90_vm2, %v80_v36, 2102212464  ;;  %v95_v40 = vsel %vm87_vm1, %v74_v34, %v77_v35  ;;  %v99_v41 = vsel %vm87_vm1, %v77_v35, %v80_v36  ;;  %v96_v43 = vsel %vm90_vm2, %v83_v37, 920167782 }
  0x74   :  { %v100_v44 = vsel %vm90_vm2, %v86_v38, 1326507024  ;;  %v97_v45 = vsel %vm89_vm3, %v80_v36, %v96_v43  ;;  %v91_v48 = vsel %vm87_vm1, %v71_v42, %v74_v34  ;;  %v93_v49 = vsel %vm89_vm3, %v77_v35, %v92_v39 }
  0x75   :  { %v101_v46 = vsel %vm89_vm3, %v83_v37, %v100_v44  ;;  %v98_v50 = vsel %vm88_vm4, %v95_v40, %v97_v45  ;;  %v94_v56 = vsel %vm88_vm4, %v91_v48, %v93_v49  ;;  %v169_v35 = vstv %s312_s1 }
  0x76   :  { %v102_v51 = vsel %vm88_vm4, %v99_v41, %v101_v46  ;;  %v326_v54 = vmul.u32.u64.low %v103_v47, %v98_v50  ;;  %v327_v55 = vmul.u32.u64.high %v103_v47, %v98_v50, %v326_v54  ;;  %v110_v58 = vmul.u32 %v103_v47, %v94_v56 }
  0x77   :  { %v323_v52 = vmul.u32.u64.low %v103_v47, %v102_v51  ;;  %v324_v53 = vmul.u32.u64.high %v103_v47, %v102_v51, %v323_v52  ;;  %v164_v37 = vmul.f32 %v163_v32, %v308_v2  ;;  %v170_v40 = vmul.f32 %v169_v35, %v308_v2 }
  0x78   :  { %v113_v57 = vadd.s32 1, %v327_v55  ;;  %v176_v42 = vshrl.u32 %v175_v11, 7 }
  0x79   :  { %vm112_vm5 = vc.u32 %v324_v53, %v326_v54  ;;  %v111_v8 = vadd.s32 %v326_v54, %v324_v53  ;;  %v166_v43 = vrot.slane %v164_v37, 1  ;;  %v172_v45 = vrot.slane %v170_v40, 2 }
  0x7a   :  { %v114_v59 = vsel %vm112_vm5, %v113_v57, %v327_v55  ;;  %v177_v47 = vsub.s32 2, %v176_v42 }
  0x7b   :  { %v115_v60 = vadd.s32 %v114_v59, %v110_v58 }
  0x7d   :  { %v116_v61 = vadd.s32 536870912, %v115_v60 }
  0x7f   :  { %v117_v62 = vshrl.u32 %v116_v61, 30 }
  0x81   :  { %v118_v63 = vshll.u32 %v117_v62, 30  ;;  %v141_v22 = vsub.s32 4, %v117_v62 }
  0x83   :  { %v119_v0 = vsub.s32 %v115_v60, %v118_v63  ;;  %v142_v25 = vsel %vm57_vm7, %v141_v22, %v117_v62 }
  0x84   :  { %v144_v26 = vsel %vm56_vm8, 0, %v142_v25 }
  0x85   :  { %v121_v1 = vsub.s32 0, %v119_v0  ;;  %v148_v27 = vadd.s32 3, %v144_v26 }
  0x87   :  { %v200_v3 = vmin.u32 %v121_v1, %v119_v0  ;;  %v149_v28 = vand.u32 3, %v148_v27 }
  0x89   :  { %v123_v4 = vclz %v200_v3  ;;  %vm154_vm9 = vcmp.eq.s32.totalorder %v149_v28, 2  ;;  %vm151_vm10 = vcmp.eq.s32.totalorder %v149_v28, 0  ;;  %vm150_vm11 = vcmp.lt.s32.totalorder %v149_v28, 2 }
  0x8b   :  { %v201_v5 = vadd.s32 4294967294, %v123_v4 }
  0x8d   :  { %vm202_vm6 = vcmp.lt.s32.totalorder %v201_v5, 0 }
  0x8e   :  { %v126_v7 = vsel %vm202_vm6, 0, %v201_v5 }
  0x8f   :  { %v127_v9 = vsub.s32 32, %v126_v7  ;;  %v131_v10 = vsub.s32 4294967266, %v126_v7  ;;  %v128_v12 = vshll.u32 %v119_v0, %v126_v7 }
  0x91   :  { %v129_v13 = vshrl.u32 %v111_v8, %v127_v9  ;;  %v132_v14 = vadd.s32 127, %v131_v10 }
  0x93   :  { %v130_v15 = vor.u32 %v129_v13, %v128_v12  ;;  %v133_v16 = vshll.u32 %v132_v14, 23 }
  0x95   :  { %v134_v17 = vor.u32 4788187, %v133_v16  ;;  %v137_v19 = vcvt.s32.f32 %v130_v15 }
  0x97   :  { %v135_v18 = vand.u32 2147483647, %v134_v17 }
  0x99   :  { %v138_v20 = vmul.f32 %v137_v19, %v135_v18 }
  0x9b   :  { %v139_v21 = vxor.u32 2147483648, %v138_v20 }
  0x9d   :  { %v140_v23 = vsel %vm57_vm7, %v139_v21, %v138_v20 }
  0x9e   :  { %v143_v24 = vsel %vm56_vm8, %v317_v6, %v140_v23 }
  0x9f   :  { %220 = vcosq.f32 %v143_v24 }
  0xa0   :  { %222 = vsinq.f32 %v143_v24 }
  0xac   :  { %v221_v29 = vpop.eup %220 }
  0xad   :  { %v223_v30 = vpop.eup %222  ;;  %v155_v31 = vxor.u32 2147483648, %v221_v29 }
  0xae   :  { %v152_v33 = vxor.u32 2147483648, %v223_v30 }
  0xaf   :  { %v156_v34 = vsel %vm154_vm9, %v155_v31, %v223_v30 }
  0xb0   :  { %v153_v36 = vsel %vm151_vm10, %v221_v29, %v152_v33 }
  0xb1   :  { %v157_v38 = vsel %vm150_vm11, %v153_v36, %v156_v34 }
  0xb2   :  { %v158_v39 = vsel %vm147_vm12, nan, %v157_v38 }
  0xb3   :  { %v160_v41 = vrot.slane %v158_v39, 6 }
  0xb5   :  { %v162_v44 = vmul.f32 %v160_v41, %v308_v2 }
  0xb7   :  { %v168_v46 = vadd.f32 %v166_v43, %v162_v44 }
  0xb9   :  { %v174_v48 = vadd.f32 %v172_v45, %v168_v46 }
  0xbb   :  { %v178_v49 = vrot.slane %v174_v48, %v177_v47 }
  0xbd   :  { %180 = vst.msk [vmem:[#allocation7] sm:$0x3] %vm179_vm13, %v178_v49 }
  0xbe   :  { %263 = shalt.err (!%p260_p9)
}
  0xbf   :  { %190 = dma.vmem_to_hbm [thread:$0]  %s188_s24, 32, %s348_s2, [#allocation4]  }
  0xc0   :  { %276 = dma.done.wait [#allocation4], 32  }
  0xc1   :  { %277 = vsyncadd [#allocation4], 4294967264 }
  0xc2   :  { %194 = vsyncpa [#allocation3], 1 }
  0xc3   :  { %195 = vsyncpa [#allocation4], 1 }
  0xc4   :  { %196 = vsyncpa [#allocation5], 1 }

</bundles_post_ra>
